<compile_context>
chip_gen: v6e
topology: v6e:2x2x1
jax: 0.10.0
libtpu: 0.0.40
codegen_flags: <defaults>
</compile_context>

<pallas_src>
import functools

import jax
import jax.numpy as jnp
from jax.experimental import pallas as pl
from jax.experimental.pallas import tpu as pltpu

BN_EPS = 1e-5


def _round_up(x, m):
    return ((x + m - 1) // m) * m


# --------------------------------------------------------------------------- #
# Pallas kernels
# --------------------------------------------------------------------------- #
def _gemm_bn_kernel(a_ref, b_ref, scale_ref, shift_ref, o_ref, *, relu):
    """(tm,K)@(K,tn) on the MXU with fused BN scale/shift (+ReLU) epilogue."""
    acc = jnp.dot(a_ref[...], b_ref[...], preferred_element_type=jnp.float32)
    y = acc * scale_ref[...] + shift_ref[...]
    if relu:
        y = jnp.maximum(y, 0.0)
    o_ref[...] = y.astype(o_ref.dtype)


def _gemm_bn_add_relu_kernel(a_ref, b_ref, scale_ref, shift_ref, r_ref, o_ref):
    """Matmul with fused BN + residual add + ReLU epilogue (BasicBlock tail)."""
    acc = jnp.dot(a_ref[...], b_ref[...], preferred_element_type=jnp.float32)
    y = acc * scale_ref[...] + shift_ref[...] + r_ref[...].astype(jnp.float32)
    o_ref[...] = jnp.maximum(y, 0.0).astype(o_ref.dtype)


def _max9_kernel(*refs):
    """Running max over 9 shifted-window inputs (3x3 max-pool)."""
    o_ref = refs[-1]
    m = refs[0][...]
    for r in refs[1:-1]:
        m = jnp.maximum(m, r[...])
    o_ref[...] = m


def _gap_kernel(x_ref, o_ref, *, inv):
    """Global average pool: (1, HW, C) -> (1, 1, C), f32 accumulation."""
    s = jnp.sum(x_ref[...].astype(jnp.float32), axis=1, keepdims=True)
    o_ref[...] = s * inv


# --------------------------------------------------------------------------- #
# Fused conv GEMM (im2col glue in JAX, matmul + BN/ReLU/residual in Pallas)
# --------------------------------------------------------------------------- #
def fused_conv_gemm(a, b, scale2d, shift2d, *, relu, residual=None):
    """a: (M, K) bf16 patches, b: (K, Cout) bf16 weights, scale/shift: (1, Cout) f32.
    Returns (M, Cout) bf16 = act(BN(a @ b) [+ residual])."""
    M, K = a.shape
    K2, Cout = b.shape
    assert K == K2

    tn = Cout if Cout <= 256 else 256
    tm = min(256, _round_up(M, 16))
    Mp = _round_up(M, tm)
    if Mp != M:
        a = jnp.pad(a, ((0, Mp - M), (0, 0)))
        if residual is not None:
            residual = jnp.pad(residual, ((0, Mp - M), (0, 0)))

    in_specs = [
        pl.BlockSpec((tm, K), lambda i, j: (i, 0)),    # A: full K, row-tiled
        pl.BlockSpec((K, tn), lambda i, j: (0, j)),    # B: full K, col-tiled
        pl.BlockSpec((1, tn), lambda i, j: (0, j)),    # scale
        pl.BlockSpec((1, tn), lambda i, j: (0, j)),    # shift
    ]
    args = [a, b, scale2d, shift2d]
    if residual is not None:
        in_specs.append(pl.BlockSpec((tm, tn), lambda i, j: (i, j)))
        args.append(residual)
        kernel = _gemm_bn_add_relu_kernel
    else:
        kernel = functools.partial(_gemm_bn_kernel, relu=relu)

    out = pl.pallas_call(
        kernel,
        out_shape=jax.ShapeDtypeStruct((Mp, Cout), jnp.bfloat16),
        grid_spec=pltpu.PrefetchScalarGridSpec(
            num_scalar_prefetch=0,
            grid=(Mp // tm, Cout // tn),
            in_specs=in_specs,
            out_specs=pl.BlockSpec((tm, tn), lambda i, j: (i, j)),
        ),
        compiler_params=pltpu.CompilerParams(
            dimension_semantics=("parallel", "parallel")
        ),
    )(*args)
    if Mp != M:
        out = out[:M]
    return out


def im2col(x, KH, KW, stride, padding):
    """x: (N,H,W,Cin) bf16 -> ((N*Ho*Wo, KH*KW*Cin) bf16, Ho, Wo)."""
    # TODO(synk): im2col taps are still materialized by XLA in HBM; a direct-conv
    # kernel with manual halo DMA (pl.ANY + make_async_copy) would remove that
    # expansion entirely.
    N, H, W, Cin = x.shape
    Ho = (H + 2 * padding - KH) // stride + 1
    Wo = (W + 2 * padding - KW) // stride + 1
    xp = x
    if padding:
        xp = jnp.pad(x, ((0, 0), (padding, padding), (padding, padding), (0, 0)))
    if KH == 1 and KW == 1:
        patches = xp if stride == 1 else xp[:, ::stride, ::stride, :]
    else:
        taps = [
            xp[:, kh : kh + stride * Ho : stride, kw : kw + stride * Wo : stride, :]
            for kh in range(KH)
            for kw in range(KW)
        ]
        patches = jnp.concatenate(taps, axis=-1)
    return patches.reshape(N * Ho * Wo, KH * KW * Cin), Ho, Wo


def conv_bn_act(x, cp, *, stride, padding, relu, residual=None):
    """Conv + folded-BN (+residual) (+ReLU) via one fused Pallas GEMM."""
    N = x.shape[0]
    a, Ho, Wo = im2col(x, cp["kh"], cp["kw"], stride, padding)
    res2d = None
    if residual is not None:
        res2d = residual.reshape(N * Ho * Wo, cp["cout"])
    y = fused_conv_gemm(a, cp["w2d"], cp["scale"], cp["shift"],
                        relu=relu, residual=res2d)
    return y.reshape(N, Ho, Wo, cp["cout"])


# --------------------------------------------------------------------------- #
# Pooling kernels
# --------------------------------------------------------------------------- #
def maxpool_3x3_s2_p1(x):
    N, H, W, C = x.shape
    Ho = (H + 2 - 3) // 2 + 1
    Wo = (W + 2 - 3) // 2 + 1
    xp = jnp.pad(x, ((0, 0), (1, 1), (1, 1), (0, 0)), constant_values=-jnp.inf)
    taps = [
        xp[:, kh : kh + 2 * Ho : 2, kw : kw + 2 * Wo : 2, :].reshape(N * Ho * Wo, C)
        for kh in range(3)
        for kw in range(3)
    ]
    M = N * Ho * Wo
    # Lane-dense repack when channels < 128 (C=64 stage): pure elementwise max,
    # so any consistent reshape of all taps/output is valid.
    if C < 128 and (M * C) % 128 == 0:
        Cw = 128
        Mw = (M * C) // 128
        taps = [t.reshape(Mw, Cw) for t in taps]
    else:
        Cw, Mw = C, M

    tr = min(512, _round_up(Mw, 16))
    Mp = _round_up(Mw, tr)
    if Mp != Mw:
        taps = [jnp.pad(t, ((0, Mp - Mw), (0, 0))) for t in taps]

    out = pl.pallas_call(
        _max9_kernel,
        out_shape=jax.ShapeDtypeStruct((Mp, Cw), x.dtype),
        grid_spec=pltpu.PrefetchScalarGridSpec(
            num_scalar_prefetch=0,
            grid=(Mp // tr,),
            in_specs=[pl.BlockSpec((tr, Cw), lambda i: (i, 0))] * 9,
            out_specs=pl.BlockSpec((tr, Cw), lambda i: (i, 0)),
        ),
        compiler_params=pltpu.CompilerParams(dimension_semantics=("parallel",)),
    )(*taps)
    if Mp != Mw:
        out = out[:Mw]
    return out.reshape(M, C).reshape(N, Ho, Wo, C)


def global_avg_pool(x):
    """adaptive_avg_pool2d(x, (1,1)) + flatten -> (N, C) f32."""
    N, H, W, C = x.shape
    HW = H * W
    x3 = x.reshape(N, HW, C)
    out = pl.pallas_call(
        functools.partial(_gap_kernel, inv=1.0 / HW),
        out_shape=jax.ShapeDtypeStruct((N, 1, C), jnp.float32),
        grid_spec=pltpu.PrefetchScalarGridSpec(
            num_scalar_prefetch=0,
            grid=(N,),
            in_specs=[pl.BlockSpec((1, HW, C), lambda n: (n, 0, 0))],
            out_specs=pl.BlockSpec((1, 1, C), lambda n: (n, 0, 0)),
        ),
        compiler_params=pltpu.CompilerParams(dimension_semantics=("parallel",)),
    )(x3)
    return out.reshape(N, C)


# --------------------------------------------------------------------------- #
# ResNet18 trunk (conv1/bn1/relu/maxpool/layer1..4) + global average pool
# --------------------------------------------------------------------------- #
def basic_block(x, p):
    identity = x
    out = conv_bn_act(x, p["conv1"], stride=p["stride"], padding=1, relu=True)
    if "ds" in p:
        identity = conv_bn_act(x, p["ds"], stride=p["stride"], padding=0, relu=False)
    # conv2 -> bn2 -> (+identity) -> relu, all fused in one GEMM epilogue.
    out = conv_bn_act(out, p["conv2"], stride=1, padding=1, relu=True,
                      residual=identity)
    return out


def image_encoder_forward(params, x_nchw, return_patch_embeddings=False):
    x = jnp.transpose(x_nchw, (0, 2, 3, 1)).astype(jnp.bfloat16)  # NCHW -> NHWC
    x = conv_bn_act(x, params["conv1"], stride=2, padding=3, relu=True)
    x = maxpool_3x3_s2_p1(x)
    for layer in params["layers"]:
        for block in layer:
            x = basic_block(x, block)
    pooled = global_avg_pool(x)                              # (N, 512) f32
    patch = jnp.transpose(x.astype(jnp.float32), (0, 3, 1, 2))  # NCHW like PyTorch
    if return_patch_embeddings:
        return patch, pooled
    return pooled


# --------------------------------------------------------------------------- #
# Deterministic synthetic parameters (ResNet18 shapes) + one-time prep
# --------------------------------------------------------------------------- #
def make_conv(key, kh, kw, cin, cout):
    fan_in = kh * kw * cin
    return jax.random.normal(key, (kh, kw, cin, cout), jnp.float32) * (2.0 / fan_in) ** 0.5


def make_bn(key, c):
    k1, k2, k3, k4 = jax.random.split(key, 4)
    return dict(
        gamma=1.0 + 0.1 * jax.random.normal(k1, (c,), jnp.float32),
        beta=0.1 * jax.random.normal(k2, (c,), jnp.float32),
        mean=0.1 * jax.random.normal(k3, (c,), jnp.float32),
        var=1.0 + 0.1 * jnp.abs(jax.random.normal(k4, (c,), jnp.float32)),
    )


def prep_conv(w_hwio, bn):
    """Fold BN into scale/shift, flatten weight to (K, Cout) bf16 — done once."""
    KH, KW, Cin, Cout = w_hwio.shape
    scale = bn["gamma"] / jnp.sqrt(bn["var"] + BN_EPS)
    shift = bn["beta"] - bn["mean"] * scale
    return dict(
        kh=KH, kw=KW, cout=Cout,
        w2d=w_hwio.reshape(KH * KW * Cin, Cout).astype(jnp.bfloat16),
        scale=scale.reshape(1, Cout).astype(jnp.float32),
        shift=shift.reshape(1, Cout).astype(jnp.float32),
    )


def init_resnet18(key):
    keys = iter(jax.random.split(key, 128))
    params = {
        "conv1": prep_conv(make_conv(next(keys), 7, 7, 3, 64), make_bn(next(keys), 64)),
    }
    layer_cfg = [(64, 64, 1, 2), (64, 128, 2, 2), (128, 256, 2, 2), (256, 512, 2, 2)]
    layers = []
    for cin, cout, stride, nblocks in layer_cfg:
        blocks = []
        for b in range(nblocks):
            s = stride if b == 0 else 1
            ci = cin if b == 0 else cout
            blk = dict(
                stride=s,
                conv1=prep_conv(make_conv(next(keys), 3, 3, ci, cout),
                                make_bn(next(keys), cout)),
                conv2=prep_conv(make_conv(next(keys), 3, 3, cout, cout),
                                make_bn(next(keys), cout)),
            )
            if s != 1 or ci != cout:
                blk["ds"] = prep_conv(make_conv(next(keys), 1, 1, ci, cout),
                                      make_bn(next(keys), cout))
            blocks.append(blk)
        layers.append(blocks)
    params["layers"] = layers
    return params


# --------------------------------------------------------------------------- #
if __name__ == "__main__":
    key = jax.random.PRNGKey(0)
    pkey, xkey = jax.random.split(key)
    params = init_resnet18(pkey)

    # Small but architecture-consistent input: ResNet18 needs 3 channels;
    # 64x64 keeps every stage >= 1x1 (layer4 output is 2x2).
    x = jax.random.normal(xkey, (2, 3, 64, 64), jnp.float32)

    patch, pooled = image_encoder_forward(params, x, return_patch_embeddings=True)
    pooled_only = image_encoder_forward(params, x, return_patch_embeddings=False)

    jax.block_until_ready(patch)
    jax.block_until_ready(pooled)
    jax.block_until_ready(pooled_only)

    assert patch.shape == (2, 512, 2, 2), patch.shape
    assert pooled.shape == (2, 512), pooled.shape
    assert pooled_only.shape == (2, 512), pooled_only.shape
    assert bool(jnp.allclose(pooled, pooled_only))
    assert bool(jnp.all(jnp.isfinite(pooled)))
    assert bool(jnp.all(jnp.isfinite(patch)))

    print("KERNEL_OK")
</pallas_src>

<mosaic_0001>
module attributes {stable_mosaic.version = 11 : i64} {
  func.func @_gemm_bn_kernel(%arg0: i32, %arg1: i32, %arg2: memref<256x147xbf16, #tpu.memory_space<vmem>>, %arg3: memref<147x64xbf16, #tpu.memory_space<vmem>>, %arg4: memref<1x64xf32, #tpu.memory_space<vmem>>, %arg5: memref<1x64xf32, #tpu.memory_space<vmem>>, %arg6: memref<256x64xbf16, #tpu.memory_space<vmem>>) attributes {dimension_semantics = [#tpu.dimension_semantics<parallel>, #tpu.dimension_semantics<parallel>], iteration_bounds = array<i64: 8, 1>, scalar_prefetch = 0 : i64, scratch_operands = 0 : i64, tpu.core_type = #tpu.core_type<tc>, window_params = [{transform_indices = @transform_0, window_bounds = array<i64: 256, 147>}, {transform_indices = @transform_1, window_bounds = array<i64: 147, 64>}, {transform_indices = @transform_2, window_bounds = array<i64: 1, 64>}, {transform_indices = @transform_3, window_bounds = array<i64: 1, 64>}, {transform_indices = @transform_4, window_bounds = array<i64: 256, 64>}]} {
    %c0 = arith.constant 0 : index
    %c0_0 = arith.constant 0 : index
    %0 = vector.load %arg2[%c0, %c0_0] : memref<256x147xbf16, #tpu.memory_space<vmem>>, vector<256x147xbf16>
    %c0_1 = arith.constant 0 : index
    %c0_2 = arith.constant 0 : index
    %1 = vector.load %arg3[%c0_1, %c0_2] : memref<147x64xbf16, #tpu.memory_space<vmem>>, vector<147x64xbf16>
    %cst = arith.constant dense<0.000000e+00> : vector<256x64xf32>
    %2 = tpu.matmul %0, %1, %cst {dimension_numbers = #tpu.dot_dimension_numbers<[1], [0], [0], [1], [0, 0, 1, 1], [], []>} : vector<256x147xbf16>, vector<147x64xbf16>, vector<256x64xf32> -> vector<256x64xf32>
    %c0_3 = arith.constant 0 : index
    %c0_4 = arith.constant 0 : index
    %3 = vector.load %arg4[%c0_3, %c0_4] : memref<1x64xf32, #tpu.memory_space<vmem>>, vector<1x64xf32>
    %4 = vector.broadcast %3 : vector<1x64xf32> to vector<256x64xf32>
    %5 = arith.mulf %2, %4 : vector<256x64xf32>
    %c0_5 = arith.constant 0 : index
    %c0_6 = arith.constant 0 : index
    %6 = vector.load %arg5[%c0_5, %c0_6] : memref<1x64xf32, #tpu.memory_space<vmem>>, vector<1x64xf32>
    %7 = vector.broadcast %6 : vector<1x64xf32> to vector<256x64xf32>
    %8 = arith.addf %5, %7 : vector<256x64xf32>
    %cst_7 = arith.constant 0.000000e+00 : f32
    %9 = vector.broadcast %cst_7 : f32 to vector<256x64xf32>
    %10 = arith.maximumf %8, %9 : vector<256x64xf32>
    %11 = arith.truncf %10 : vector<256x64xf32> to vector<256x64xbf16>
    %c0_8 = arith.constant 0 : index
    %c0_9 = arith.constant 0 : index
    %12 = vector.load %arg6[%c0_8, %c0_9] : memref<256x64xbf16, #tpu.memory_space<vmem>>, vector<256x64xbf16>
    tpu.vector_store %arg6[%c0_8, %c0_9], %11 {strides = array<i32>} : memref<256x64xbf16, #tpu.memory_space<vmem>>, vector<256x64xbf16>,
    return
  }
  func.func @transform_0(%arg0: i32, %arg1: i32) -> (i32, i32) {
    %c0_i32 = arith.constant 0 : i32
    %c0_i32_0 = arith.constant 0 : i32
    return %arg0, %c0_i32 : i32, i32
  }
  func.func @transform_1(%arg0: i32, %arg1: i32) -> (i32, i32) {
    %c0_i32 = arith.constant 0 : i32
    %c0_i32_0 = arith.constant 0 : i32
    return %c0_i32, %arg1 : i32, i32
  }
  func.func @transform_2(%arg0: i32, %arg1: i32) -> (i32, i32) {
    %c0_i32 = arith.constant 0 : i32
    %c0_i32_0 = arith.constant 0 : i32
    return %c0_i32, %arg1 : i32, i32
  }
  func.func @transform_3(%arg0: i32, %arg1: i32) -> (i32, i32) {
    %c0_i32 = arith.constant 0 : i32
    %c0_i32_0 = arith.constant 0 : i32
    return %c0_i32, %arg1 : i32, i32
  }
  func.func @transform_4(%arg0: i32, %arg1: i32) -> (i32, i32) {
    %c0_i32 = arith.constant 0 : i32
    return %arg0, %arg1 : i32, i32
  }
}

</mosaic_0001>

<bundles_post_ra>
// kernel: tpu_custom_call.1
= control target key start
LH: loop header
LB: loop body
LE: loop exit
PB: predicated region body
PF: predicated region fallthrough
CT: control target
= control target key end

     0   :  { %s1419_s15 = smov 0   ;;  %s1421_s16 = smov 0   ;;  %s1676_s0 = inlined_call_operand.vmem [shape: bf16[2048,147], index: 0, kind: input, shape index: {}]   ;;  %s1677_s1 = inlined_call_operand.vmem [shape: bf16[147,64], index: 1, kind: input, shape index: {}]   ;;  %s1678_s2 = inlined_call_operand.vmem [shape: f32[1,64], index: 2, kind: input, shape index: {}]   ;;  %s1679_s3 = inlined_call_operand.vmem [shape: f32[1,64], index: 3, kind: input, shape index: {}]   ;;  %s1680_s4 = inlined_call_operand.vmem [shape: bf16[2048,64], index: 4, kind: output, shape index: {}]  }
   0x1   :  { %s1423_s17 = smov 0  }
   0x2 LB: > { %s26_s18 = sadd.s32 1, %s1386_s16  ;;  %p1131_p0 = scmp.ge.s32.totalorder %s1390_s17, 1  ;;  %s1390_s17 = sphi %s1423_s17, %s14_s17   ;;  %s1386_s16 = sphi %s1421_s16, %s1682_s16   ;;  %s1382_s15 = sphi %s1419_s15, %s1681_s15  }
   0x3   : > { %p28_p1 = scmp.ge.s32.totalorder %s26_s18, 8  ;;  %p203_p2 = scmp.lt.s32.totalorder %s1390_s17, 9 }
   0x5   : > { %s1684_s18 = smov (%p28_p1, %s26_s18), 0  ;;  %p204_p3 = pnand %p1131_p0, %p203_p2 }
   0x6   : > { %s1132_s25 = sshll.u32 (!%p204_p3), %s1382_s15, 5 }
   0x7   : > { %207 = sbr.rel (%p204_p3) target bundleno = 315 (0x13b), region = 36  ;;  %p244_p4 = scmp.lt.s32.totalorder (!%p204_p3), %s1132_s25, 255 }
   0xc   : > { %v1310_v0 = vld [vmem:[%s1677_s1 + $0x38] sm:$0xff]   ;;  %v1392_v1 = vmov 0   ;;  %v1311_v2 = vld [vmem:[%s1677_s1 + $0x30] sm:$0xff]   ;;  %v1312_v3 = vld [vmem:[%s1677_s1 + $0x28] sm:$0xff]   ;;  %s1686_s25 = smov (!%p244_p4, %s1132_s25), 255  ;;  %vm522_vm0 = vcmask 154624  }
   0xd   : > { %578 = vmatprep.subr.bf16.mxu0 %v1392_v1  ;;  %1264 = vmatprep.subr.bf16.mxu1 %v1392_v1  ;;  %v1313_v4 = vld [vmem:[%s1677_s1 + $0x20] sm:$0xff]   ;;  %s1231_s28 = sshll.u32 %s1686_s25, 3  ;;  %v1314_v5 = vld [vmem:[%s1677_s1 + $0x18] sm:$0xff]   ;;  %v1315_v8 = vld [vmem:[%s1677_s1 + $0x10] sm:$0xff]   ;;  %vm571_vm1 = vcmask 1040384   ;;  %vm572_vm2 = vcmask 1041408  }
   0xe   : > { %579 = vmatpush1.bf16.msra.mxu0 %v1310_v0  ;;  %1274 = vmatpush1.bf16.msra.mxu1 %v1310_v0  ;;  %s1455_s5 = scalar_lea.vmem %s1676_s0, %s1231_s28  ;;  %v1316_v9 = vld [vmem:[%s1677_s1 + $0x8] sm:$0xff]   ;;  %v1393_v10 = vmov 65535   ;;  %v1317_v12 = vld [vmem:[%s1677_s1] sm:$0xff]   ;;  %s1136_s26 = sshll.u32 %s1686_s25, 2  ;;  %vm977_vm3 = vcmask 519168  }
   0xf   : > { %580 = vmatprep.subr.bf16.mxu0 %v1392_v1  ;;  %1265 = vmatprep.subr.bf16.mxu1 %v1392_v1  ;;  %v1322_v6 = vld [vmem:[%s1455_s5 + $0x4] ss:$8 sps:$4 sm:$0xff]   ;;  %v573_v11 = vsel %vm571_vm1, 4294967295, %v1393_v10  ;;  %v1318_v13 = vld [vmem:[%s1677_s1 + $0x48] ss:$0 sps:$4 sm:$0x33]   ;;  %s1543_s29 = scalar_lea.vmem %s1680_s4, %s1136_s26 }
  0x10   : > { %v1325_v7 = vld [vmem:[%s1455_s5 + $0x84] ss:$8 sps:$4 sm:$0xff]   ;;  %1179 = vmatprep.mubr.msk.bf16.mxu0 %vm522_vm0, %v1322_v6  ;;  %v574_v14 = vsel %vm572_vm2, %v573_v11, 0  ;;  %v1320_v17 = vld [vmem:[%s1455_s5] ss:$8 sps:$4 sm:$0xff]  }
  0x11   : > { %1187 = vmatprep.mubr.msk.bf16.mxu1 %vm522_vm0, %v1325_v7  ;;  %v576_v15 = vand.u32 %v1318_v13, %v574_v14  ;;  %v1319_v16 = vld [vmem:[%s1677_s1 + $0x40] sm:$0xff]   ;;  %v1326_v19 = vld [vmem:[%s1455_s5 + $0x14] ss:$8 sps:$4 sm:$0xff]   ;;  %v1330_v21 = vld [vmem:[%s1455_s5 + $0x10] ss:$8 sps:$4 sm:$0xff]  }
  0x12   : > { %581 = vmatpush1.bf16.msra.mxu0 %v1311_v2  ;;  %1275 = vmatpush1.bf16.msra.mxu1 %v1311_v2  ;;  %v1323_v18 = vld [vmem:[%s1455_s5 + $0x80] ss:$8 sps:$4 sm:$0xff]   ;;  %v1328_v20 = vld [vmem:[%s1455_s5 + $0x94] ss:$8 sps:$4 sm:$0xff]   ;;  %v1331_v22 = vld [vmem:[%s1455_s5 + $0x90] ss:$8 sps:$4 sm:$0xff]  }
  0x13   : > { %582 = vmatprep.subr.bf16.mxu0 %v1392_v1  ;;  %1266 = vmatprep.subr.bf16.mxu1 %v1392_v1  ;;  %v1332_v23 = vld [vmem:[%s1455_s5 + $0x24] ss:$8 sps:$4 sm:$0xff]   ;;  %v1336_v25 = vld [vmem:[%s1455_s5 + $0x20] ss:$8 sps:$4 sm:$0xff]   ;;  %v1338_v27 = vld [vmem:[%s1455_s5 + $0x34] ss:$8 sps:$4 sm:$0xff]  }
  0x14   : > { %v1334_v24 = vld [vmem:[%s1455_s5 + $0xa4] ss:$8 sps:$4 sm:$0xff]   ;;  %v1337_v26 = vld [vmem:[%s1455_s5 + $0xa0] ss:$8 sps:$4 sm:$0xff]   ;;  %v1340_v28 = vld [vmem:[%s1455_s5 + $0xb4] ss:$8 sps:$4 sm:$0xff]  }
  0x15   : > { %v1342_v29 = vld [vmem:[%s1455_s5 + $0x30] ss:$8 sps:$4 sm:$0xff]   ;;  %v1344_v31 = vld [vmem:[%s1455_s5 + $0x44] ss:$8 sps:$4 sm:$0xff]   ;;  %v1348_v33 = vld [vmem:[%s1455_s5 + $0x40] ss:$8 sps:$4 sm:$0xff]  }
  0x16   : > { %583 = vmatpush1.bf16.msra.mxu0 %v1312_v3  ;;  %1276 = vmatpush1.bf16.msra.mxu1 %v1312_v3  ;;  %v1343_v30 = vld [vmem:[%s1455_s5 + $0xb0] ss:$8 sps:$4 sm:$0xff]   ;;  %v1346_v32 = vld [vmem:[%s1455_s5 + $0xc4] ss:$8 sps:$4 sm:$0xff]   ;;  %v1349_v34 = vld [vmem:[%s1455_s5 + $0xc0] ss:$8 sps:$4 sm:$0xff]  }
  0x17   : > { %584 = vmatprep.subr.bf16.mxu0 %v1392_v1  ;;  %1267 = vmatprep.subr.bf16.mxu1 %v1392_v1  ;;  %v1350_v35 = vld [vmem:[%s1455_s5 + $0x54] ss:$8 sps:$4 sm:$0xff]   ;;  %v1354_v37 = vld [vmem:[%s1455_s5 + $0x50] ss:$8 sps:$4 sm:$0xff]   ;;  %v1356_v39 = vld [vmem:[%s1455_s5 + $0x64] ss:$8 sps:$4 sm:$0xff]  }
  0x18   : > { %v1352_v36 = vld [vmem:[%s1455_s5 + $0xd4] ss:$8 sps:$4 sm:$0xff]   ;;  %v1355_v38 = vld [vmem:[%s1455_s5 + $0xd0] ss:$8 sps:$4 sm:$0xff]   ;;  %v1358_v40 = vld [vmem:[%s1455_s5 + $0xe4] ss:$8 sps:$4 sm:$0xff]  }
  0x19   : > { %v1360_v41 = vld [vmem:[%s1455_s5 + $0x60] ss:$8 sps:$4 sm:$0xff]   ;;  %v1362_v43 = vld [vmem:[%s1455_s5 + $0x74] ss:$8 sps:$4 sm:$0xff]   ;;  %v1366_v45 = vld [vmem:[%s1455_s5 + $0x70] ss:$8 sps:$4 sm:$0xff]  }
  0x1a   : > { %585 = vmatpush1.bf16.msra.mxu0 %v1313_v4  ;;  %1277 = vmatpush1.bf16.msra.mxu1 %v1313_v4  ;;  %v1361_v42 = vld [vmem:[%s1455_s5 + $0xe0] ss:$8 sps:$4 sm:$0xff]   ;;  %v1364_v44 = vld [vmem:[%s1455_s5 + $0xf4] ss:$8 sps:$4 sm:$0xff]   ;;  %v1367_v46 = vld [vmem:[%s1455_s5 + $0xf0] ss:$8 sps:$4 sm:$0xff]  }
  0x1b   : > { %586 = vmatprep.subr.bf16.mxu0 %v1392_v1  ;;  %1268 = vmatprep.subr.bf16.mxu1 %v1392_v1  ;;  %v1526_v47 = vld [vmem:[%s1678_s2] ss:$0 sm:$0xff] }
  0x1c   : > { %v1531_v49 = vld [vmem:[%s1679_s3] ss:$0 sm:$0xff] }
  0x1e   : > { %587 = vmatpush1.bf16.msra.mxu0 %v1314_v5  ;;  %1278 = vmatpush1.bf16.msra.mxu1 %v1314_v5 }
  0x1f   : > { %588 = vmatprep.subr.bf16.mxu0 %v1392_v1  ;;  %1269 = vmatprep.subr.bf16.mxu1 %v1392_v1 }
  0x22   : > { %589 = vmatpush1.bf16.msra.mxu0 %v1315_v8  ;;  %1279 = vmatpush1.bf16.msra.mxu1 %v1315_v8 }
  0x23   : > { %590 = vmatprep.subr.bf16.mxu0 %v1392_v1  ;;  %1270 = vmatprep.subr.bf16.mxu1 %v1392_v1 }
  0x26   : > { %591 = vmatpush1.bf16.msra.mxu0 %v1316_v9  ;;  %1280 = vmatpush1.bf16.msra.mxu1 %v1316_v9 }
  0x27   : > { %592 = vmatprep.subr.bf16.mxu0 %v1392_v1  ;;  %1271 = vmatprep.subr.bf16.mxu1 %v1392_v1 }
  0x2a   : > { %593 = vmatpush1.bf16.msra.mxu0 %v1317_v12  ;;  %1281 = vmatpush1.bf16.msra.mxu1 %v1317_v12 }
  0x2b   : > { %606 = vmatprep.subr.bf16.mxu0 %v1392_v1  ;;  %1272 = vmatprep.subr.bf16.mxu1 %v1392_v1 }
  0x2e   : > { %607 = vmatpush2.bf16.msra.mxu0 %v576_v15  ;;  %1282 = vmatpush2.bf16.msra.mxu1 %v576_v15 }
  0x2f   : > { %608 = vmatprep.subr.bf16.mxu0 %v1392_v1  ;;  %1273 = vmatprep.subr.bf16.mxu1 %v1392_v1 }
  0x32   : > { %609 = vmatpush2.bf16.msra.mxu0 %v1319_v16  ;;  %1283 = vmatpush2.bf16.msra.mxu1 %v1319_v16 }
  0x35   : > { %611 = vmatmul.mubr.bf16.vlgmr.msra.gmra.mxu0 %v1320_v17  ;;  %675 = vmatmul.mubr.bf16.vlgmr.msra.gmra.mxu1 %v1323_v18 }
  0x36   : > { %1180 = vmatprep.mubr.msk.bf16.mxu0 %vm522_vm0, %v1326_v19  ;;  %1188 = vmatprep.mubr.msk.bf16.mxu1 %vm522_vm0, %v1328_v20 }
  0x3d   : > { %619 = vmatmul.mubr.bf16.gmra.mxu0 %v1330_v21  ;;  %683 = vmatmul.mubr.bf16.gmra.mxu1 %v1331_v22 }
  0x3e   : > { %1181 = vmatprep.mubr.msk.bf16.mxu0 %vm522_vm0, %v1332_v23  ;;  %1189 = vmatprep.mubr.msk.bf16.mxu1 %vm522_vm0, %v1334_v24 }
  0x45   : > { %627 = vmatmul.mubr.bf16.gmra.mxu0 %v1336_v25  ;;  %691 = vmatmul.mubr.bf16.gmra.mxu1 %v1337_v26 }
  0x46   : > { %1182 = vmatprep.mubr.msk.bf16.mxu0 %vm522_vm0, %v1338_v27  ;;  %1190 = vmatprep.mubr.msk.bf16.mxu1 %vm522_vm0, %v1340_v28 }
  0x4d   : > { %635 = vmatmul.mubr.bf16.gmra.mxu0 %v1342_v29  ;;  %699 = vmatmul.mubr.bf16.gmra.mxu1 %v1343_v30 }
  0x4e   : > { %1183 = vmatprep.mubr.msk.bf16.mxu0 %vm522_vm0, %v1344_v31  ;;  %1191 = vmatprep.mubr.msk.bf16.mxu1 %vm522_vm0, %v1346_v32 }
  0x55   : > { %643 = vmatmul.mubr.bf16.gmra.mxu0 %v1348_v33  ;;  %707 = vmatmul.mubr.bf16.gmra.mxu1 %v1349_v34 }
  0x56   : > { %1184 = vmatprep.mubr.msk.bf16.mxu0 %vm522_vm0, %v1350_v35  ;;  %1192 = vmatprep.mubr.msk.bf16.mxu1 %vm522_vm0, %v1352_v36 }
  0x5d   : > { %651 = vmatmul.mubr.bf16.gmra.mxu0 %v1354_v37  ;;  %715 = vmatmul.mubr.bf16.gmra.mxu1 %v1355_v38 }
  0x5e   : > { %1185 = vmatprep.mubr.msk.bf16.mxu0 %vm522_vm0, %v1356_v39  ;;  %1193 = vmatprep.mubr.msk.bf16.mxu1 %vm522_vm0, %v1358_v40 }
  0x65   : > { %659 = vmatmul.mubr.bf16.gmra.mxu0 %v1360_v41  ;;  %723 = vmatmul.mubr.bf16.gmra.mxu1 %v1361_v42 }
  0x66   : > { %1186 = vmatprep.mubr.msk.bf16.mxu0 %vm522_vm0, %v1362_v43  ;;  %1194 = vmatprep.mubr.msk.bf16.mxu1 %vm522_vm0, %v1364_v44 }
  0x6d   : > { %667 = vmatmul.mubr.bf16.gmra.mxu0 %v1366_v45  ;;  %731 = vmatmul.mubr.bf16.gmra.mxu1 %v1367_v46 }
  0xf5   : > { %v612_v48 = vpop.f32.mrf.mxu0  ;;  %v676_v50 = vpop.f32.mrf.mxu1 }
  0xf6   : > { %v746_v51 = vmul.f32 %v1526_v47, %v612_v48  ;;  %v762_v52 = vmul.f32 %v1526_v47, %v676_v50 }
  0xf7   : > { %v614_v53 = vpop.f32.mrf.mxu0  ;;  %v678_v54 = vpop.f32.mrf.mxu1 }
  0xf8   : > { %v785_v55 = vadd.f32 %v1531_v49, %v746_v51  ;;  %v801_v56 = vadd.f32 %v1531_v49, %v762_v52 }
  0xf9   : > { %v615_v57 = vpop.f32.mrf.mxu0  ;;  %v679_v58 = vpop.f32.mrf.mxu1 }
  0xfa   : > { %v817_v59 = vmax.f32 %v785_v55, 0.0  ;;  %v833_v60 = vmax.f32 %v801_v56, 0.0  ;;  %v747_v61 = vmul.f32 %v1526_v47, %v615_v57  ;;  %v763_v62 = vmul.f32 %v1526_v47, %v679_v58 }
  0xfb   : > { %v617_v63 = vpop.f32.mrf.mxu0  ;;  %v681_v0 = vpop.f32.mrf.mxu1 }
  0xfc   : > { %v1232_v1 = vpack.c.bf16 %v817_v59, %v817_v59  ;;  %v1248_v2 = vpack.c.bf16 %v833_v60, %v833_v60  ;;  %v786_v3 = vadd.f32 %v1531_v49, %v747_v61  ;;  %v802_v4 = vadd.f32 %v1531_v49, %v763_v62 }
  0xfd   : > { %v620_v5 = vpop.f32.mrf.mxu0  ;;  %v684_v6 = vpop.f32.mrf.mxu1 }
  0xfe   : > { %978 = vst.msk [vmem:[%s1543_s29] sm:$0xf] %vm977_vm3, %v1232_v1  ;;  %994 = vst.msk [vmem:[%s1543_s29 + $0x40] sm:$0xf] %vm977_vm3, %v1248_v2  ;;  %v818_v7 = vmax.f32 %v786_v3, 0.0  ;;  %v834_v8 = vmax.f32 %v802_v4, 0.0  ;;  %v748_v9 = vmul.f32 %v1526_v47, %v620_v5  ;;  %v764_v10 = vmul.f32 %v1526_v47, %v684_v6 }
  0xff   : > { %v622_v11 = vpop.f32.mrf.mxu0  ;;  %v686_v12 = vpop.f32.mrf.mxu1 }
 0x100   : > { %v1233_v13 = vpack.c.bf16 %v818_v7, %v818_v7  ;;  %v1249_v14 = vpack.c.bf16 %v834_v8, %v834_v8  ;;  %v787_v15 = vadd.f32 %v1531_v49, %v748_v9  ;;  %v803_v16 = vadd.f32 %v1531_v49, %v764_v10 }
 0x101   : > { %v623_v17 = vpop.f32.mrf.mxu0  ;;  %v687_v18 = vpop.f32.mrf.mxu1 }
 0x102   : > { %979 = vst.msk [vmem:[%s1543_s29 + $0x4] sm:$0xf] %vm977_vm3, %v1233_v13  ;;  %995 = vst.msk [vmem:[%s1543_s29 + $0x44] sm:$0xf] %vm977_vm3, %v1249_v14  ;;  %v819_v19 = vmax.f32 %v787_v15, 0.0  ;;  %v835_v20 = vmax.f32 %v803_v16, 0.0  ;;  %v749_v21 = vmul.f32 %v1526_v47, %v623_v17  ;;  %v765_v22 = vmul.f32 %v1526_v47, %v687_v18 }
 0x103   : > { %v625_v23 = vpop.f32.mrf.mxu0  ;;  %v689_v24 = vpop.f32.mrf.mxu1 }
 0x104   : > { %v1234_v25 = vpack.c.bf16 %v819_v19, %v819_v19  ;;  %v1250_v26 = vpack.c.bf16 %v835_v20, %v835_v20  ;;  %v788_v27 = vadd.f32 %v1531_v49, %v749_v21  ;;  %v804_v28 = vadd.f32 %v1531_v49, %v765_v22 }
 0x105   : > { %v628_v29 = vpop.f32.mrf.mxu0  ;;  %v692_v30 = vpop.f32.mrf.mxu1 }
 0x106   : > { %980 = vst.msk [vmem:[%s1543_s29 + $0x8] sm:$0xf] %vm977_vm3, %v1234_v25  ;;  %996 = vst.msk [vmem:[%s1543_s29 + $0x48] sm:$0xf] %vm977_vm3, %v1250_v26  ;;  %v820_v31 = vmax.f32 %v788_v27, 0.0  ;;  %v836_v32 = vmax.f32 %v804_v28, 0.0  ;;  %v750_v33 = vmul.f32 %v1526_v47, %v628_v29  ;;  %v766_v34 = vmul.f32 %v1526_v47, %v692_v30 }
 0x107   : > { %v630_v35 = vpop.f32.mrf.mxu0  ;;  %v694_v36 = vpop.f32.mrf.mxu1 }
 0x108   : > { %v1235_v37 = vpack.c.bf16 %v820_v31, %v820_v31  ;;  %v1251_v38 = vpack.c.bf16 %v836_v32, %v836_v32  ;;  %v789_v39 = vadd.f32 %v1531_v49, %v750_v33  ;;  %v805_v40 = vadd.f32 %v1531_v49, %v766_v34 }
 0x109   : > { %v631_v41 = vpop.f32.mrf.mxu0  ;;  %v695_v42 = vpop.f32.mrf.mxu1 }
 0x10a   : > { %981 = vst.msk [vmem:[%s1543_s29 + $0xc] sm:$0xf] %vm977_vm3, %v1235_v37  ;;  %997 = vst.msk [vmem:[%s1543_s29 + $0x4c] sm:$0xf] %vm977_vm3, %v1251_v38  ;;  %v821_v43 = vmax.f32 %v789_v39, 0.0  ;;  %v837_v44 = vmax.f32 %v805_v40, 0.0  ;;  %v751_v45 = vmul.f32 %v1526_v47, %v631_v41  ;;  %v767_v46 = vmul.f32 %v1526_v47, %v695_v42 }
 0x10b   : > { %v633_v48 = vpop.f32.mrf.mxu0  ;;  %v697_v50 = vpop.f32.mrf.mxu1 }
 0x10c   : > { %v1236_v51 = vpack.c.bf16 %v821_v43, %v821_v43  ;;  %v1252_v52 = vpack.c.bf16 %v837_v44, %v837_v44  ;;  %v790_v53 = vadd.f32 %v1531_v49, %v751_v45  ;;  %v806_v54 = vadd.f32 %v1531_v49, %v767_v46 }
 0x10d   : > { %v636_v55 = vpop.f32.mrf.mxu0  ;;  %v700_v56 = vpop.f32.mrf.mxu1 }
 0x10e   : > { %982 = vst.msk [vmem:[%s1543_s29 + $0x10] sm:$0xf] %vm977_vm3, %v1236_v51  ;;  %998 = vst.msk [vmem:[%s1543_s29 + $0x50] sm:$0xf] %vm977_vm3, %v1252_v52  ;;  %v822_v57 = vmax.f32 %v790_v53, 0.0  ;;  %v838_v58 = vmax.f32 %v806_v54, 0.0  ;;  %v752_v59 = vmul.f32 %v1526_v47, %v636_v55  ;;  %v768_v60 = vmul.f32 %v1526_v47, %v700_v56 }
 0x10f   : > { %v638_v61 = vpop.f32.mrf.mxu0  ;;  %v702_v62 = vpop.f32.mrf.mxu1 }
 0x110   : > { %v1237_v63 = vpack.c.bf16 %v822_v57, %v822_v57  ;;  %v1253_v0 = vpack.c.bf16 %v838_v58, %v838_v58  ;;  %v791_v1 = vadd.f32 %v1531_v49, %v752_v59  ;;  %v807_v2 = vadd.f32 %v1531_v49, %v768_v60 }
 0x111   : > { %v639_v3 = vpop.f32.mrf.mxu0  ;;  %v703_v4 = vpop.f32.mrf.mxu1 }
 0x112   : > { %983 = vst.msk [vmem:[%s1543_s29 + $0x14] sm:$0xf] %vm977_vm3, %v1237_v63  ;;  %999 = vst.msk [vmem:[%s1543_s29 + $0x54] sm:$0xf] %vm977_vm3, %v1253_v0  ;;  %v823_v5 = vmax.f32 %v791_v1, 0.0  ;;  %v839_v6 = vmax.f32 %v807_v2, 0.0  ;;  %v753_v7 = vmul.f32 %v1526_v47, %v639_v3  ;;  %v769_v8 = vmul.f32 %v1526_v47, %v703_v4 }
 0x113   : > { %v641_v9 = vpop.f32.mrf.mxu0  ;;  %v705_v10 = vpop.f32.mrf.mxu1 }
 0x114   : > { %v1238_v11 = vpack.c.bf16 %v823_v5, %v823_v5  ;;  %v1254_v12 = vpack.c.bf16 %v839_v6, %v839_v6  ;;  %v792_v13 = vadd.f32 %v1531_v49, %v753_v7  ;;  %v808_v14 = vadd.f32 %v1531_v49, %v769_v8 }
 0x115   : > { %v644_v15 = vpop.f32.mrf.mxu0  ;;  %v708_v16 = vpop.f32.mrf.mxu1 }
 0x116   : > { %984 = vst.msk [vmem:[%s1543_s29 + $0x18] sm:$0xf] %vm977_vm3, %v1238_v11  ;;  %1000 = vst.msk [vmem:[%s1543_s29 + $0x58] sm:$0xf] %vm977_vm3, %v1254_v12  ;;  %v824_v17 = vmax.f32 %v792_v13, 0.0  ;;  %v840_v18 = vmax.f32 %v808_v14, 0.0  ;;  %v754_v19 = vmul.f32 %v1526_v47, %v644_v15  ;;  %v770_v20 = vmul.f32 %v1526_v47, %v708_v16 }
 0x117   : > { %v646_v21 = vpop.f32.mrf.mxu0  ;;  %v710_v22 = vpop.f32.mrf.mxu1 }
 0x118   : > { %v1239_v23 = vpack.c.bf16 %v824_v17, %v824_v17  ;;  %v1255_v24 = vpack.c.bf16 %v840_v18, %v840_v18  ;;  %v793_v25 = vadd.f32 %v1531_v49, %v754_v19  ;;  %v809_v26 = vadd.f32 %v1531_v49, %v770_v20 }
 0x119   : > { %v647_v27 = vpop.f32.mrf.mxu0  ;;  %v711_v28 = vpop.f32.mrf.mxu1 }
 0x11a   : > { %985 = vst.msk [vmem:[%s1543_s29 + $0x1c] sm:$0xf] %vm977_vm3, %v1239_v23  ;;  %1001 = vst.msk [vmem:[%s1543_s29 + $0x5c] sm:$0xf] %vm977_vm3, %v1255_v24  ;;  %v825_v29 = vmax.f32 %v793_v25, 0.0  ;;  %v841_v30 = vmax.f32 %v809_v26, 0.0  ;;  %v755_v31 = vmul.f32 %v1526_v47, %v647_v27  ;;  %v771_v32 = vmul.f32 %v1526_v47, %v711_v28 }
 0x11b   : > { %v649_v33 = vpop.f32.mrf.mxu0  ;;  %v713_v34 = vpop.f32.mrf.mxu1 }
 0x11c   : > { %v1240_v35 = vpack.c.bf16 %v825_v29, %v825_v29  ;;  %v1256_v36 = vpack.c.bf16 %v841_v30, %v841_v30  ;;  %v794_v37 = vadd.f32 %v1531_v49, %v755_v31  ;;  %v810_v38 = vadd.f32 %v1531_v49, %v771_v32 }
 0x11d   : > { %v652_v39 = vpop.f32.mrf.mxu0  ;;  %v716_v40 = vpop.f32.mrf.mxu1 }
 0x11e   : > { %986 = vst.msk [vmem:[%s1543_s29 + $0x20] sm:$0xf] %vm977_vm3, %v1240_v35  ;;  %1002 = vst.msk [vmem:[%s1543_s29 + $0x60] sm:$0xf] %vm977_vm3, %v1256_v36  ;;  %v826_v41 = vmax.f32 %v794_v37, 0.0  ;;  %v842_v42 = vmax.f32 %v810_v38, 0.0  ;;  %v756_v43 = vmul.f32 %v1526_v47, %v652_v39  ;;  %v772_v44 = vmul.f32 %v1526_v47, %v716_v40 }
 0x11f   : > { %v654_v45 = vpop.f32.mrf.mxu0  ;;  %v718_v46 = vpop.f32.mrf.mxu1 }
 0x120   : > { %v1241_v48 = vpack.c.bf16 %v826_v41, %v826_v41  ;;  %v1257_v50 = vpack.c.bf16 %v842_v42, %v842_v42  ;;  %v795_v51 = vadd.f32 %v1531_v49, %v756_v43  ;;  %v811_v52 = vadd.f32 %v1531_v49, %v772_v44 }
 0x121   : > { %v655_v53 = vpop.f32.mrf.mxu0  ;;  %v719_v54 = vpop.f32.mrf.mxu1 }
 0x122   : > { %987 = vst.msk [vmem:[%s1543_s29 + $0x24] sm:$0xf] %vm977_vm3, %v1241_v48  ;;  %1003 = vst.msk [vmem:[%s1543_s29 + $0x64] sm:$0xf] %vm977_vm3, %v1257_v50  ;;  %v827_v55 = vmax.f32 %v795_v51, 0.0  ;;  %v843_v56 = vmax.f32 %v811_v52, 0.0  ;;  %v757_v57 = vmul.f32 %v1526_v47, %v655_v53  ;;  %v773_v58 = vmul.f32 %v1526_v47, %v719_v54 }
 0x123   : > { %v657_v59 = vpop.f32.mrf.mxu0  ;;  %v721_v60 = vpop.f32.mrf.mxu1 }
 0x124   : > { %v1242_v61 = vpack.c.bf16 %v827_v55, %v827_v55  ;;  %v1258_v62 = vpack.c.bf16 %v843_v56, %v843_v56  ;;  %v796_v63 = vadd.f32 %v1531_v49, %v757_v57  ;;  %v812_v0 = vadd.f32 %v1531_v49, %v773_v58 }
 0x125   : > { %v660_v1 = vpop.f32.mrf.mxu0  ;;  %v724_v2 = vpop.f32.mrf.mxu1 }
 0x126   : > { %988 = vst.msk [vmem:[%s1543_s29 + $0x28] sm:$0xf] %vm977_vm3, %v1242_v61  ;;  %1004 = vst.msk [vmem:[%s1543_s29 + $0x68] sm:$0xf] %vm977_vm3, %v1258_v62  ;;  %v828_v3 = vmax.f32 %v796_v63, 0.0  ;;  %v844_v4 = vmax.f32 %v812_v0, 0.0  ;;  %v758_v5 = vmul.f32 %v1526_v47, %v660_v1  ;;  %v774_v6 = vmul.f32 %v1526_v47, %v724_v2 }
 0x127   : > { %v662_v7 = vpop.f32.mrf.mxu0  ;;  %v726_v8 = vpop.f32.mrf.mxu1 }
 0x128   : > { %v1243_v9 = vpack.c.bf16 %v828_v3, %v828_v3  ;;  %v1259_v10 = vpack.c.bf16 %v844_v4, %v844_v4  ;;  %v797_v11 = vadd.f32 %v1531_v49, %v758_v5  ;;  %v813_v12 = vadd.f32 %v1531_v49, %v774_v6 }
 0x129   : > { %v663_v13 = vpop.f32.mrf.mxu0  ;;  %v727_v14 = vpop.f32.mrf.mxu1 }
 0x12a   : > { %989 = vst.msk [vmem:[%s1543_s29 + $0x2c] sm:$0xf] %vm977_vm3, %v1243_v9  ;;  %1005 = vst.msk [vmem:[%s1543_s29 + $0x6c] sm:$0xf] %vm977_vm3, %v1259_v10  ;;  %v829_v15 = vmax.f32 %v797_v11, 0.0  ;;  %v845_v16 = vmax.f32 %v813_v12, 0.0  ;;  %v759_v17 = vmul.f32 %v1526_v47, %v663_v13  ;;  %v775_v18 = vmul.f32 %v1526_v47, %v727_v14 }
 0x12b   : > { %v665_v19 = vpop.f32.mrf.mxu0  ;;  %v729_v20 = vpop.f32.mrf.mxu1 }
 0x12c   : > { %v1244_v21 = vpack.c.bf16 %v829_v15, %v829_v15  ;;  %v1260_v22 = vpack.c.bf16 %v845_v16, %v845_v16  ;;  %v798_v23 = vadd.f32 %v1531_v49, %v759_v17  ;;  %v814_v24 = vadd.f32 %v1531_v49, %v775_v18 }
 0x12d   : > { %v668_v25 = vpop.f32.mrf.mxu0  ;;  %v732_v26 = vpop.f32.mrf.mxu1 }
 0x12e   : > { %990 = vst.msk [vmem:[%s1543_s29 + $0x30] sm:$0xf] %vm977_vm3, %v1244_v21  ;;  %1006 = vst.msk [vmem:[%s1543_s29 + $0x70] sm:$0xf] %vm977_vm3, %v1260_v22  ;;  %v830_v27 = vmax.f32 %v798_v23, 0.0  ;;  %v846_v28 = vmax.f32 %v814_v24, 0.0  ;;  %v760_v29 = vmul.f32 %v1526_v47, %v668_v25  ;;  %v776_v30 = vmul.f32 %v1526_v47, %v732_v26 }
 0x12f   : > { %v670_v31 = vpop.f32.mrf.mxu0  ;;  %v734_v32 = vpop.f32.mrf.mxu1 }
 0x130   : > { %v1245_v33 = vpack.c.bf16 %v830_v27, %v830_v27  ;;  %v1261_v34 = vpack.c.bf16 %v846_v28, %v846_v28  ;;  %v799_v35 = vadd.f32 %v1531_v49, %v760_v29  ;;  %v815_v36 = vadd.f32 %v1531_v49, %v776_v30 }
 0x131   : > { %v671_v37 = vpop.f32.mrf.mxu0  ;;  %v735_v38 = vpop.f32.mrf.mxu1 }
 0x132   : > { %991 = vst.msk [vmem:[%s1543_s29 + $0x34] sm:$0xf] %vm977_vm3, %v1245_v33  ;;  %1007 = vst.msk [vmem:[%s1543_s29 + $0x74] sm:$0xf] %vm977_vm3, %v1261_v34  ;;  %v831_v39 = vmax.f32 %v799_v35, 0.0  ;;  %v847_v40 = vmax.f32 %v815_v36, 0.0  ;;  %v761_v41 = vmul.f32 %v1526_v47, %v671_v37  ;;  %v777_v42 = vmul.f32 %v1526_v47, %v735_v38 }
 0x133   : > { %v673_v43 = vpop.f32.mrf.mxu0  ;;  %v737_v44 = vpop.f32.mrf.mxu1 }
 0x134   : > { %v1246_v45 = vpack.c.bf16 %v831_v39, %v831_v39  ;;  %v1262_v46 = vpack.c.bf16 %v847_v40, %v847_v40  ;;  %v800_v48 = vadd.f32 %v1531_v49, %v761_v41  ;;  %v816_v50 = vadd.f32 %v1531_v49, %v777_v42 }
 0x136   : > { %992 = vst.msk [vmem:[%s1543_s29 + $0x38] sm:$0xf] %vm977_vm3, %v1246_v45  ;;  %1008 = vst.msk [vmem:[%s1543_s29 + $0x78] sm:$0xf] %vm977_vm3, %v1262_v46  ;;  %v832_v51 = vmax.f32 %v800_v48, 0.0  ;;  %v848_v52 = vmax.f32 %v816_v50, 0.0 }
 0x138   : > { %v1247_v53 = vpack.c.bf16 %v832_v51, %v832_v51  ;;  %v1263_v54 = vpack.c.bf16 %v848_v52, %v848_v52 }
 0x13a   : > { %993 = vst.msk [vmem:[%s1543_s29 + $0x3c] sm:$0xf] %vm977_vm3, %v1247_v53  ;;  %1009 = vst.msk [vmem:[%s1543_s29 + $0x7c] sm:$0xf] %vm977_vm3, %v1263_v54 }
 0x13b PF: > { %s14_s17 = sadd.s32 1, %s1390_s17   ;;  %s1681_s15 = smov %s1386_s16 }
 0x13c   : > { %p11_p5 = scmp.ge.s32.totalorder %s14_s17, 10   ;;  %s1682_s16 = smov %s1684_s18 }
 0x13e   :  { %13 = sbr.rel (!%p11_p5) target bundleno = 2 (0x2), region = 75 }

</bundles_post_ra>
